<compile_context>
chip_gen: v7x
topology: tpu7x:2x2x1
jax: 0.10.0
libtpu: 0.0.40
codegen_flags: <defaults>
</compile_context>

<pallas_src>
import jax
import jax.numpy as jnp
from jax.experimental import pallas as pl
from jax.experimental.pallas import tpu as pltpu


# Lane-dense last-axis candidates; pick the widest that divides the element
# count so the wrapper avoids pad/slice HBM passes for common shapes.
_LANE_CHOICES = (1024, 512, 256, 128)
# ~2 MiB f32 per tile (512 * 1024 elements).
_TILE_ELEMS = 512 * 1024

_TWO_PI = 6.283185307179586
_HAS_STATEFUL_NORMAL = hasattr(pltpu, "stateful_normal")


def _bits_to_unit_uniform(bits):
    """uint32 random bits -> f32 uniform in [0, 1) via the mantissa trick."""
    if bits.dtype != jnp.uint32:
        bits = pltpu.bitcast(bits, jnp.uint32)
    mant = bits & jnp.uint32(0x007FFFFF)
    return pltpu.bitcast(mant | jnp.uint32(0x3F800000), jnp.float32) - 1.0


def _standard_normal(shape):
    """Standard-normal draw from the on-chip PRNG (prng_seed already called)."""
    if _HAS_STATEFUL_NORMAL:
        # Built-in draw: avoids the log/sin/cos VPU polynomial chain and the
        # sublane concat, keeping the kernel HBM-bound on v6e/v7x.
        return pltpu.stateful_normal(shape, jnp.float32)
    # Guarded fallback: single-output Box-Muller (cos branch only, no concat).
    u1 = _bits_to_unit_uniform(pltpu.prng_random_bits(shape))
    u2 = _bits_to_unit_uniform(pltpu.prng_random_bits(shape))
    r = jnp.sqrt(-2.0 * jnp.log(1.0 - u1))
    return r * jnp.cos(jnp.float32(_TWO_PI) * u2)


def _noise_add_kernel_tpu(seed_ref, std_ref, x_ref, o_ref):
    """o = x + std * N(0,1); noise drawn from the hardware PRNG per tile."""
    # Per-tile seed so every grid step draws an independent stream.
    pltpu.prng_seed(seed_ref[0], pl.program_id(0))
    z = _standard_normal(x_ref.shape)
    o_ref[...] = (x_ref[...].astype(jnp.float32) + std_ref[0] * z).astype(o_ref.dtype)


def _add_kernel_fallback(x_ref, n_ref, o_ref):
    """Non-TPU backends: noise precomputed outside, kernel is just a tiled add."""
    o_ref[...] = (x_ref[...].astype(jnp.float32) + n_ref[...]).astype(o_ref.dtype)


def _add_gaussian_noise(x, std, seed):
    """y = x + std * N(0,1), elementwise, any shape/dtype."""
    orig_shape = x.shape
    dtype = x.dtype
    n = x.size

    # Lane-dense 2-D slab in the original dtype (no f32 round trip in HBM).
    lanes = next((c for c in _LANE_CHOICES if n % c == 0), None)
    flat = x.reshape(-1)
    padded = lanes is None
    if padded:
        # Truly ragged element count: pad only to the next 128-lane multiple.
        lanes = 128
        n_pad = pl.cdiv(n, lanes) * lanes
        flat = jnp.pad(flat, (0, n_pad - n))
    else:
        n_pad = n
    rows = n_pad // lanes
    x2d = flat.reshape(rows, lanes)

    # Tile rows: the whole array if it fits in one tile, otherwise a multiple
    # of 8; a ragged last row-block is handled by Pallas (partial writeback).
    block_rows = min(rows, max(8, _TILE_ELEMS // lanes))
    if block_rows < rows:
        block_rows = (block_rows // 8) * 8
    grid = (pl.cdiv(rows, block_rows),)

    if jax.default_backend() == "tpu":
        seed_arr = jnp.asarray([seed], dtype=jnp.int32)
        std_arr = jnp.asarray([std], dtype=jnp.float32)
        y2d = pl.pallas_call(
            _noise_add_kernel_tpu,
            out_shape=jax.ShapeDtypeStruct(x2d.shape, dtype),
            grid_spec=pltpu.PrefetchScalarGridSpec(
                num_scalar_prefetch=1,                                   # seed
                grid=grid,
                in_specs=[
                    pl.BlockSpec(memory_space=pltpu.MemorySpace.SMEM),   # std
                    pl.BlockSpec((block_rows, lanes), lambda i, seed: (i, 0)),
                ],
                out_specs=pl.BlockSpec((block_rows, lanes), lambda i, seed: (i, 0)),
            ),
            compiler_params=pltpu.CompilerParams(
                dimension_semantics=("parallel",),
                vmem_limit_bytes=32 * 1024 * 1024,
            ),
        )(seed_arr, std_arr, x2d)
    else:
        # TODO(synk): the on-chip PRNG has no CPU/interpret lowering; sample
        # the noise with jax.random here and keep only the tiled add in Pallas.
        noise = jnp.float32(std) * jax.random.normal(
            jax.random.PRNGKey(seed), x2d.shape, dtype=jnp.float32)
        blk = pl.BlockSpec((block_rows, lanes), lambda i: (i, 0))
        y2d = pl.pallas_call(
            _add_kernel_fallback,
            out_shape=jax.ShapeDtypeStruct(x2d.shape, dtype),
            grid=grid,
            in_specs=[blk, blk],
            out_specs=blk,
        )(x2d, noise)

    out = y2d.reshape(-1)
    if padded:
        out = out[:n]
    return out.reshape(orig_shape)


class Generator:
    """JAX/Pallas port of the PyTorch Generator module (normalstd noise)."""

    def __init__(self, method="normalstd", trainable=True, std=0.1):
        assert method in ("uniform", "uniformstd", "normalstd", "constantstd")
        self.method = method
        self.trainable = trainable
        # NoiseDistribution's (learnable) std parameter.
        self.std = jnp.float32(std)
        self.training = True
        # TODO(synk): only the 'normalstd' rsample (std * N(0,1)) is implemented;
        # 'uniform'/'uniformstd'/'constantstd' need their own sampling formulas.

    def __call__(self, x, seed=0):
        if not self.training:
            return x
        return _add_gaussian_noise(x, self.std, seed)


if __name__ == "__main__":
    key = jax.random.PRNGKey(0)
    B, C, H, W = 2, 4, 16, 16
    x = jax.random.normal(key, (B, C, H, W), dtype=jnp.float32)

    gen = Generator(method="normalstd", trainable=True, std=0.1)

    # training-mode forward (noise added inside the Pallas kernel)
    gen.training = True
    y = gen(x, seed=1234)
    y = jax.block_until_ready(y)
    assert y.shape == x.shape and y.dtype == x.dtype
    # noise should actually perturb the input
    assert bool(jnp.any(y != x))
    # perturbation magnitude should be on the order of std=0.1
    diff = y - x
    assert float(jnp.max(jnp.abs(diff))) < 1.0
    s = float(jnp.std(diff))
    assert 0.02 < s < 0.5, s

    # eval-mode forward is the identity
    gen.training = False
    y_eval = jax.block_until_ready(gen(x))
    assert bool(jnp.all(y_eval == x))

    print("KERNEL_OK")
</pallas_src>

<mosaic_0001>
module attributes {stable_mosaic.version = 11 : i64} {
  func.func @_add_kernel_fallback(%arg0: i32, %arg1: memref<2x1024xf32, #tpu.memory_space<vmem>>, %arg2: memref<2x1024xf32, #tpu.memory_space<vmem>>, %arg3: memref<2x1024xf32, #tpu.memory_space<vmem>>) attributes {dimension_semantics = [#tpu.dimension_semantics<arbitrary>], iteration_bounds = array<i64: 1>, scalar_prefetch = 0 : i64, scratch_operands = 0 : i64, tpu.core_type = #tpu.core_type<tc>, window_params = [{transform_indices = @transform_0, window_bounds = array<i64: 2, 1024>}, {transform_indices = @transform_1, window_bounds = array<i64: 2, 1024>}, {transform_indices = @transform_2, window_bounds = array<i64: 2, 1024>}]} {
    %c0 = arith.constant 0 : index
    %c0_0 = arith.constant 0 : index
    %0 = vector.load %arg1[%c0, %c0_0] : memref<2x1024xf32, #tpu.memory_space<vmem>>, vector<2x1024xf32>
    %c0_1 = arith.constant 0 : index
    %c0_2 = arith.constant 0 : index
    %1 = vector.load %arg2[%c0_1, %c0_2] : memref<2x1024xf32, #tpu.memory_space<vmem>>, vector<2x1024xf32>
    %2 = arith.addf %0, %1 : vector<2x1024xf32>
    %c0_3 = arith.constant 0 : index
    %c0_4 = arith.constant 0 : index
    %3 = vector.load %arg3[%c0_3, %c0_4] : memref<2x1024xf32, #tpu.memory_space<vmem>>, vector<2x1024xf32>
    tpu.vector_store %arg3[%c0_3, %c0_4], %2 {strides = array<i32>} : memref<2x1024xf32, #tpu.memory_space<vmem>>, vector<2x1024xf32>,
    return
  }
  func.func @transform_0(%arg0: i32) -> (i32, i32) {
    %c0_i32 = arith.constant 0 : i32
    %c0_i32_0 = arith.constant 0 : i32
    return %arg0, %c0_i32 : i32, i32
  }
  func.func @transform_1(%arg0: i32) -> (i32, i32) {
    %c0_i32 = arith.constant 0 : i32
    %c0_i32_0 = arith.constant 0 : i32
    return %arg0, %c0_i32 : i32, i32
  }
  func.func @transform_2(%arg0: i32) -> (i32, i32) {
    %c0_i32 = arith.constant 0 : i32
    %c0_i32_0 = arith.constant 0 : i32
    return %arg0, %c0_i32 : i32, i32
  }
}

</mosaic_0001>

<bundles_post_ra>
// kernel: tpu_custom_call.1
= control target key start
LH: loop header
LB: loop body
LE: loop exit
PB: predicated region body
PF: predicated region fallthrough
CT: control target
= control target key end

     0   :  { %7 = vsyncpa [#allocation3], 0  ;;  %s189_s0 = inlined_call_operand.hbm [shape: f32[2,1024], index: 0, kind: input, shape index: {}]   ;;  %s190_s1 = inlined_call_operand.hbm [shape: f32[2,1024], index: 1, kind: input, shape index: {}]   ;;  %s191_s2 = inlined_call_operand.hbm [shape: f32[2,1024], index: 2, kind: output, shape index: {}]  }
   0x1   :  { %8 = vsyncpa [#allocation6], 0 }
   0x2   :  { %9 = vsyncpa [#allocation4], 0  ;;  %s135_s9 = smov [#allocation2]   ;;  %s136_s11 = smov [#allocation5]  }
   0x3   :  { %s16_s10 = sshll.u32 %s135_s9, 4  ;;  %s26_s12 = sshll.u32 %s136_s11, 4  ;;  %s17_s10 = int_to_ptr.vmem [resolvable:$true] %s16_s10  ;;  %s27_s12 = int_to_ptr.vmem [resolvable:$true] %s26_s12 }
   0x4   :  { %s63_s15 = scalar_lea.hbm %s189_s0, 256 }
   0x5   :  { %p64_p0 = scmp.ne.s32.totalorder %s189_s0, %s63_s15  ;;  %p67_p1 = scmp.lt.u32.totalorder %s63_s15, %s189_s0 }
   0x7   :  { %p69_p2 = pnand %p67_p1, %p64_p0 }
   0x9   :  { %72 = shalt.err (!%p69_p2)
}
   0xa   :  { %s73_s20 = scalar_lea.vmem %s17_s10, 256  ;;  %p78_p4 = scmp.lt.s32.totalorder %s17_s10, %s17_s10 }
   0xb   :  { %p74_p3 = scmp.ne.s32.totalorder %s17_s10, %s73_s20  ;;  %p79_p5 = scmp.lt.s32.totalorder %s73_s20, %s73_s20 }
   0xd   :  { %p80_p6 = por %p79_p5, %p78_p4 }
   0xf   :  { %p81_p7 = pnand %p80_p6, %p74_p3 }
  0x11   :  { %84 = shalt.err (!%p81_p7)
}
  0x12   :  { %19 = dma.hbm_to_vmem [thread:$0]  %s189_s0, 256, %s17_s10, [#allocation3]  }
  0x13   :  { %s85_s25 = scalar_lea.hbm %s190_s1, 256 }
  0x14   :  { %p86_p8 = scmp.ne.s32.totalorder %s190_s1, %s85_s25  ;;  %p89_p9 = scmp.lt.u32.totalorder %s85_s25, %s190_s1 }
  0x16   :  { %p91_p10 = pnand %p89_p9, %p86_p8 }
  0x18   :  { %94 = shalt.err (!%p91_p10)
}
  0x19   :  { %s95_s30 = scalar_lea.vmem %s27_s12, 256  ;;  %p100_p12 = scmp.lt.s32.totalorder %s27_s12, %s27_s12 }
  0x1a   :  { %p96_p11 = scmp.ne.s32.totalorder %s27_s12, %s95_s30  ;;  %p101_p13 = scmp.lt.s32.totalorder %s95_s30, %s95_s30 }
  0x1c   :  { %p102_p0 = por %p101_p13, %p100_p12 }
  0x1e   :  { %p103_p1 = pnand %p102_p0, %p96_p11 }
  0x20   :  { %106 = shalt.err (!%p103_p1)
}
  0x21   :  { %29 = dma.hbm_to_vmem [thread:$0]  %s190_s1, 256, %s27_s12, [#allocation6]  }
  0x22   :  { %129 = dma.done.wait [#allocation3], 256  }
  0x23   :  { %130 = vsyncadd [#allocation3], 4294967040 }
  0x24   :  { %131 = dma.done.wait [#allocation6], 256  }
  0x25   :  { %132 = vsyncadd [#allocation6], 4294967040  ;;  %s137_s4 = smov [#allocation7]   ;;  %v36_v0 = vld [vmem:[#allocation2] sm:$0xff]  ;;  %v38_v1 = vld [vmem:[#allocation5] sm:$0xff] }
  0x26   :  { %s50_s5 = sshll.u32 %s137_s4, 4  ;;  %v37_v2 = vld [vmem:[#allocation2 + $0x8] sm:$0xff]  ;;  %v40_v3 = vadd.f32 %v38_v1, %v36_v0  ;;  %v39_v4 = vld [vmem:[#allocation5 + $0x8] sm:$0xff]  ;;  %s51_s5 = int_to_ptr.vmem [resolvable:$true] %s50_s5 }
  0x27   :  { %v41_v5 = vadd.f32 %v39_v4, %v37_v2  ;;  %s107_s6 = scalar_lea.vmem %s51_s5, 256  ;;  %p112_p3 = scmp.lt.s32.totalorder %s51_s5, %s51_s5 }
  0x28   :  { %42 = vst [vmem:[#allocation7] sm:$0xff] %v40_v3  ;;  %p108_p2 = scmp.ne.s32.totalorder %s51_s5, %s107_s6  ;;  %p113_p4 = scmp.lt.s32.totalorder %s107_s6, %s107_s6 }
  0x29   :  { %43 = vst [vmem:[#allocation7 + $0x8] sm:$0xff] %v41_v5 }
  0x2a   :  { %p114_p5 = por %p113_p4, %p112_p3 }
  0x2c   :  { %p115_p6 = pnand %p114_p5, %p108_p2 }
  0x2e   :  { %118 = shalt.err (!%p115_p6)
}
  0x2f   :  { %s119_s8 = scalar_lea.hbm %s191_s2, 256 }
  0x30   :  { %p120_p7 = scmp.ne.s32.totalorder %s191_s2, %s119_s8  ;;  %p123_p8 = scmp.lt.u32.totalorder %s119_s8, %s191_s2 }
  0x32   :  { %p125_p9 = pnand %p123_p8, %p120_p7 }
  0x34   :  { %128 = shalt.err (!%p125_p9)
}
  0x35   :  { %53 = dma.vmem_to_hbm [thread:$0]  %s51_s5, 256, %s191_s2, [#allocation4]  }
  0x36   :  { %133 = dma.done.wait [#allocation4], 256  }
  0x37   :  { %134 = vsyncadd [#allocation4], 4294967040 }
  0x38   :  { %57 = vsyncpa [#allocation3], 1 }
  0x39   :  { %58 = vsyncpa [#allocation6], 1 }
  0x3a   :  { %59 = vsyncpa [#allocation4], 1 }

</bundles_post_ra>
